<compile_context>
chip_gen: v7x
topology: tpu7x:2x2x1
jax: 0.10.0
libtpu: 0.0.40
codegen_flags: <defaults>
</compile_context>

<pallas_src>
import jax
import jax.numpy as jnp
from jax.experimental import pallas as pl
from jax.experimental.pallas import tpu as pltpu


def _round_up(n, m):
    return ((n + m - 1) // m) * m


def hdnet_kernel(x_ref, w1_ref, b1_ref, m_ref, o_ref):
    # x_ref:  (tb, 2D)  state tile z = [q, p]            (storage dtype, streamed)
    # w1_ref: (2D, Hp)  first-layer weight (z @ W1t)     (matmul dtype, resident)
    # b1_ref: (1,  Hp)  first-layer bias                 (f32, resident)
    # m_ref:  (Hp, 2D)  folded weight w2.T*[W1t[D:].T | -W1t[:D].T]  (resident)
    # o_ref:  (tb, 2D)  output tile [dH/dp, -dH/dq]
    w1 = w1_ref[...]
    z = x_ref[...]
    if z.dtype != w1.dtype:          # static dtype check; no cast when x is bf16
        z = z.astype(w1.dtype)
    pre = jnp.dot(z, w1, preferred_element_type=jnp.float32) + b1_ref[...]
    h = jnp.tanh(pre)                # f32 on the EUP
    g = 1.0 - h * h                  # f32 on the VPU (w2 already folded into M)
    o_ref[...] = jnp.dot(
        g.astype(m_ref.dtype), m_ref[...], preferred_element_type=jnp.float32
    ).astype(o_ref.dtype)


def make_hdnet_forward(w1t, b1, w2, *, matmul_dtype=jnp.bfloat16, batch_tile=2048):
    """Build forward(t, x) for the MLP Hamiltonian. Weight fold/pad happens ONCE here."""
    two_d, hid = w1t.shape
    assert two_d % 2 == 0, "state dim must be even (x = [q, p])"
    D = two_d // 2

    # Fold transpose + symplectic swap/negate + w2 column scale into one weight:
    #   output = (1 - h^2) @ M,   M = w2.T * [ W1t[D:, :].T | -W1t[:D, :].T ]
    M = jnp.concatenate([w1t[D:, :].T, -w1t[:D, :].T], axis=1).astype(jnp.float32)
    M = w2.reshape(hid, 1).astype(jnp.float32) * M

    # Only the resident MXU-facing weights get hidden-dim 128 padding (zero
    # padding is exact: padded hidden units have b1 = 0 and zero M rows, so
    # their g = 1 contributes nothing). State dim / batch dim are NOT padded.
    hp = _round_up(hid, 128)
    w1_p = jnp.zeros((two_d, hp), matmul_dtype).at[:, :hid].set(w1t.astype(matmul_dtype))
    b1_p = jnp.zeros((1, hp), jnp.float32).at[:, :hid].set(
        b1.reshape(1, hid).astype(jnp.float32))
    m_p = jnp.zeros((hp, two_d), matmul_dtype).at[:hid, :].set(M.astype(matmul_dtype))

    @jax.jit
    def forward(t, x):
        del t  # unused (API parity with HDNet.forward(t, x))
        B, two_d_x = x.shape
        assert two_d_x == two_d

        # Batch tiling straight off the natural (B, 2D) HBM layout.
        if B <= batch_tile:
            tb = B            # full-dim block: always a legal block shape
            # v7x has 2 TensorCores: if the whole batch fits one tile but can be
            # split cleanly, use 2 grid steps so the "parallel" batch axis
            # shards across both cores (no benefit/cost on v5e/v6e).
            if B >= 1024 and (B // 2) % 8 == 0:
                tb = B // 2
        else:
            tb = batch_tile   # multiple of 8; Pallas masks the partial tail block
        grid_b = pl.cdiv(B, tb)

        # Explicit scoped-VMEM budget (v5e default is only 16 MiB).
        isz = lambda dt: jnp.dtype(dt).itemsize
        stream_bytes = 2 * tb * two_d * isz(x.dtype)                # x + o tiles
        weight_bytes = 2 * two_d * hp * isz(matmul_dtype) + hp * 4  # W1t, M, b1
        interm_bytes = 3 * tb * hp * 4                              # pre/h/g f32
        vmem_limit = int(min(max(2 * (2 * stream_bytes + 2 * weight_bytes
                                      + interm_bytes),
                                 32 * 1024 * 1024),
                             64 * 1024 * 1024))

        return pl.pallas_call(
            hdnet_kernel,
            out_shape=jax.ShapeDtypeStruct((B, two_d), x.dtype),
            grid_spec=pltpu.PrefetchScalarGridSpec(
                num_scalar_prefetch=0,
                grid=(grid_b,),
                in_specs=[
                    pl.BlockSpec((tb, two_d), lambda i: (i, 0)),  # x:   streamed
                    pl.BlockSpec((two_d, hp), lambda i: (0, 0)),  # W1t: resident
                    pl.BlockSpec((1, hp), lambda i: (0, 0)),      # b1:  resident
                    pl.BlockSpec((hp, two_d), lambda i: (0, 0)),  # M:   resident
                ],
                out_specs=pl.BlockSpec((tb, two_d), lambda i: (i, 0)),
            ),
            compiler_params=pltpu.CompilerParams(
                dimension_semantics=("parallel",),  # batch shards across TCs (v7x)
                vmem_limit_bytes=vmem_limit,
            ),
        )(x, w1_p, b1_p, m_p)

    return forward


def hdnet_reference(x, w1t, b1, w2):
    """Pure-JAX reference using real autodiff, mirroring torch.autograd.grad."""
    def H_sum(z):
        h = jnp.tanh(z @ w1t + b1)
        return jnp.sum(h @ w2.T)          # b2 omitted: constant w.r.t. z
    dH = jax.grad(H_sum)(x)
    D = x.shape[1] // 2
    dq, dp = dH[:, :D], dH[:, D:]
    return jnp.concatenate([dp, -dq], axis=1)


if __name__ == "__main__":
    B = 8          # batch
    D = 16         # q / p dimension  -> state dim 2D = 32
    HID = 64       # Hnet hidden width

    key = jax.random.PRNGKey(0)
    kx, kw1, kb1, kw2 = jax.random.split(key, 4)

    x = jax.random.normal(kx, (B, 2 * D), dtype=jnp.float32)
    t = jnp.zeros((), dtype=jnp.float32)   # unused, matches forward(t, x)

    # Deterministic Hnet parameters (nn.Linear(2D, HID), tanh, nn.Linear(HID, 1))
    w1t = 0.1 * jax.random.normal(kw1, (2 * D, HID), dtype=jnp.float32)
    b1 = 0.1 * jax.random.normal(kb1, (1, HID), dtype=jnp.float32)
    w2 = 0.1 * jax.random.normal(kw2, (1, HID), dtype=jnp.float32)
    # TODO(synk): Hnet is an arbitrary constructor-arg module in PyTorch; we use
    # a concrete 2-layer tanh MLP and its closed-form gradient (Hnet's second
    # bias b2 is constant w.r.t. z, so it drops out of the symplectic gradient).

    ref = hdnet_reference(x, w1t, b1, w2)

    # Exact-f32 path (matches autodiff reference to 1e-5)
    fwd_f32 = make_hdnet_forward(w1t, b1, w2, matmul_dtype=jnp.float32)
    out_f32 = jax.block_until_ready(fwd_f32(t, x))
    assert out_f32.shape == (B, 2 * D)
    assert jnp.allclose(out_f32, ref, atol=1e-5, rtol=1e-5), "f32 mismatch vs autodiff"

    # Default path: bf16 MXU operands + bf16 HBM activation storage
    # (f32 accumulation, f32 tanh/(1-h^2) -> safe on v5e/v6e/v7x)
    fwd_bf16 = make_hdnet_forward(w1t, b1, w2)
    out_bf16 = jax.block_until_ready(fwd_bf16(t, x.astype(jnp.bfloat16)))
    assert out_bf16.shape == (B, 2 * D)
    assert jnp.allclose(out_bf16.astype(jnp.float32), ref, atol=3e-2, rtol=3e-2), \
        "bf16 mismatch vs autodiff"

    print("KERNEL_OK")
</pallas_src>

<mosaic_0001>
module attributes {stable_mosaic.version = 11 : i64} {
  func.func @hdnet_kernel(%arg0: i32, %arg1: memref<8x32xf32, #tpu.memory_space<vmem>>, %arg2: memref<32x128xf32, #tpu.memory_space<vmem>>, %arg3: memref<1x128xf32, #tpu.memory_space<vmem>>, %arg4: memref<128x32xf32, #tpu.memory_space<vmem>>, %arg5: memref<8x32xf32, #tpu.memory_space<vmem>>) attributes {dimension_semantics = [#tpu.dimension_semantics<parallel>], iteration_bounds = array<i64: 1>, scalar_prefetch = 0 : i64, scratch_operands = 0 : i64, tpu.core_type = #tpu.core_type<tc>, window_params = [{transform_indices = @transform_0, window_bounds = array<i64: 8, 32>}, {pipeline_mode = #tpu.pipeline_mode<synchronous>, transform_indices = @transform_1, window_bounds = array<i64: 32, 128>}, {pipeline_mode = #tpu.pipeline_mode<synchronous>, transform_indices = @transform_2, window_bounds = array<i64: 1, 128>}, {pipeline_mode = #tpu.pipeline_mode<synchronous>, transform_indices = @transform_3, window_bounds = array<i64: 128, 32>}, {transform_indices = @transform_4, window_bounds = array<i64: 8, 32>}]} {
    %c0 = arith.constant 0 : index
    %c0_0 = arith.constant 0 : index
    %0 = vector.load %arg2[%c0, %c0_0] : memref<32x128xf32, #tpu.memory_space<vmem>>, vector<32x128xf32>
    %c0_1 = arith.constant 0 : index
    %c0_2 = arith.constant 0 : index
    %1 = vector.load %arg1[%c0_1, %c0_2] : memref<8x32xf32, #tpu.memory_space<vmem>>, vector<8x32xf32>
    %cst = arith.constant dense<0.000000e+00> : vector<8x128xf32>
    %2 = tpu.matmul %1, %0, %cst {dimension_numbers = #tpu.dot_dimension_numbers<[1], [0], [0], [1], [0, 0, 1, 1], [], []>} : vector<8x32xf32>, vector<32x128xf32>, vector<8x128xf32> -> vector<8x128xf32>
    %c0_3 = arith.constant 0 : index
    %c0_4 = arith.constant 0 : index
    %3 = vector.load %arg3[%c0_3, %c0_4] : memref<1x128xf32, #tpu.memory_space<vmem>>, vector<1x128xf32>
    %4 = vector.broadcast %3 : vector<1x128xf32> to vector<8x128xf32>
    %5 = arith.addf %2, %4 : vector<8x128xf32>
    %6 = math.tanh %5 : vector<8x128xf32>
    %7 = arith.mulf %6, %6 : vector<8x128xf32>
    %cst_5 = arith.constant 1.000000e+00 : f32
    %8 = vector.broadcast %cst_5 : f32 to vector<8x128xf32>
    %9 = arith.subf %8, %7 : vector<8x128xf32>
    %c0_6 = arith.constant 0 : index
    %c0_7 = arith.constant 0 : index
    %10 = vector.load %arg4[%c0_6, %c0_7] : memref<128x32xf32, #tpu.memory_space<vmem>>, vector<128x32xf32>
    %cst_8 = arith.constant dense<0.000000e+00> : vector<8x32xf32>
    %11 = tpu.matmul %9, %10, %cst_8 {dimension_numbers = #tpu.dot_dimension_numbers<[1], [0], [0], [1], [0, 0, 1, 1], [], []>} : vector<8x128xf32>, vector<128x32xf32>, vector<8x32xf32> -> vector<8x32xf32>
    %c0_9 = arith.constant 0 : index
    %c0_10 = arith.constant 0 : index
    %12 = vector.load %arg5[%c0_9, %c0_10] : memref<8x32xf32, #tpu.memory_space<vmem>>, vector<8x32xf32>
    tpu.vector_store %arg5[%c0_9, %c0_10], %11 {strides = array<i32>} : memref<8x32xf32, #tpu.memory_space<vmem>>, vector<8x32xf32>,
    return
  }
  func.func @transform_0(%arg0: i32) -> (i32, i32) {
    %c0_i32 = arith.constant 0 : i32
    %c0_i32_0 = arith.constant 0 : i32
    return %arg0, %c0_i32 : i32, i32
  }
  func.func @transform_1(%arg0: i32) -> (i32, i32) {
    %c0_i32 = arith.constant 0 : i32
    %c0_i32_0 = arith.constant 0 : i32
    %c0_i32_1 = arith.constant 0 : i32
    return %c0_i32, %c0_i32_0 : i32, i32
  }
  func.func @transform_2(%arg0: i32) -> (i32, i32) {
    %c0_i32 = arith.constant 0 : i32
    %c0_i32_0 = arith.constant 0 : i32
    %c0_i32_1 = arith.constant 0 : i32
    return %c0_i32, %c0_i32_0 : i32, i32
  }
  func.func @transform_3(%arg0: i32) -> (i32, i32) {
    %c0_i32 = arith.constant 0 : i32
    %c0_i32_0 = arith.constant 0 : i32
    %c0_i32_1 = arith.constant 0 : i32
    return %c0_i32, %c0_i32_0 : i32, i32
  }
  func.func @transform_4(%arg0: i32) -> (i32, i32) {
    %c0_i32 = arith.constant 0 : i32
    %c0_i32_0 = arith.constant 0 : i32
    return %arg0, %c0_i32 : i32, i32
  }
}

</mosaic_0001>

<bundles_post_ra>
// kernel: forward.1
= control target key start
LH: loop header
LB: loop body
LE: loop exit
PB: predicated region body
PF: predicated region fallthrough
CT: control target
= control target key end

     0   :  { %9 = vsyncpa [#allocation3], 0  ;;  %s547_s0 = inlined_call_operand.hbm [shape: f32[8,32], index: 0, kind: input, shape index: {}]   ;;  %s548_s1 = inlined_call_operand.hbm [shape: f32[32,128], index: 1, kind: input, shape index: {}]   ;;  %s549_s2 = inlined_call_operand.vmem [shape: f32[1,128], index: 2, kind: input, shape index: {}]   ;;  %s550_s3 = inlined_call_operand.hbm [shape: f32[128,32], index: 3, kind: input, shape index: {}]   ;;  %s551_s4 = inlined_call_operand.hbm [shape: f32[8,32], index: 4, kind: output, shape index: {}]  }
   0x1   :  { %10 = vsyncpa [#allocation6], 0 }
   0x2   :  { %11 = vsyncpa [#allocation4], 0  ;;  %s454_s15 = smov [#allocation5]   ;;  %s360_s19 = scalar_lea.hbm %s548_s1, 512 }
   0x3   :  { %s27_s16 = sshll.u32 %s454_s15, 4  ;;  %p361_p0 = scmp.ne.s32.totalorder %s548_s1, %s360_s19  ;;  %s28_s16 = int_to_ptr.vmem [resolvable:$true] %s27_s16 }
   0x4   :  { %p364_p1 = scmp.lt.u32.totalorder %s360_s19, %s548_s1 }
   0x6   :  { %p366_p2 = pnand %p364_p1, %p361_p0 }
   0x8   :  { %369 = shalt.err (!%p366_p2)
}
   0x9   :  { %s370_s24 = scalar_lea.vmem %s28_s16, 512  ;;  %p375_p4 = scmp.lt.s32.totalorder %s28_s16, %s28_s16 }
   0xa   :  { %p371_p3 = scmp.ne.s32.totalorder %s28_s16, %s370_s24  ;;  %p376_p5 = scmp.lt.s32.totalorder %s370_s24, %s370_s24 }
   0xc   :  { %p377_p6 = por %p376_p5, %p375_p4 }
   0xe   :  { %p378_p7 = pnand %p377_p6, %p371_p3 }
  0x10   :  { %381 = shalt.err (!%p378_p7)
}
  0x11   :  { %s455_s25 = smov 128   ;;  %s456_s26 = smov 8  }
  0x12   :  { %33 = dma.hbm_to_vmem [thread:$0]  %s548_s1, 512, %s28_s16, [#allocation6], %s455_s25, %s455_s25, %s456_s26  }
  0x13   :  { %s457_s29 = smov [#allocation2]   ;;  %s458_s5 = smov [#allocation7]  }
  0x14   :  { %s18_s30 = sshll.u32 %s457_s29, 4  ;;  %s41_s6 = sshll.u32 %s458_s5, 4  ;;  %s19_s30 = int_to_ptr.vmem [resolvable:$true] %s18_s30  ;;  %s42_s6 = int_to_ptr.vmem [resolvable:$true] %s41_s6 }
  0x15   :  { %s382_s9 = scalar_lea.hbm %s547_s0, 128 }
  0x16   :  { %p383_p8 = scmp.ne.s32.totalorder %s547_s0, %s382_s9  ;;  %p386_p9 = scmp.lt.u32.totalorder %s382_s9, %s547_s0 }
  0x18   :  { %p388_p10 = pnand %p386_p9, %p383_p8 }
  0x1a   :  { %391 = shalt.err (!%p388_p10)
}
  0x1b   :  { %s392_s1 = scalar_lea.vmem %s19_s30, 128  ;;  %p397_p12 = scmp.lt.s32.totalorder %s19_s30, %s19_s30 }
  0x1c   :  { %p393_p11 = scmp.ne.s32.totalorder %s19_s30, %s392_s1  ;;  %p398_p13 = scmp.lt.s32.totalorder %s392_s1, %s392_s1 }
  0x1e   :  { %p399_p0 = por %p398_p13, %p397_p12 }
  0x20   :  { %p400_p1 = pnand %p399_p0, %p393_p11 }
  0x22   :  { %403 = shalt.err (!%p400_p1)
}
  0x23   :  { %21 = dma.hbm_to_vmem [thread:$0]  %s547_s0, 128, %s19_s30, [#allocation3]  }
  0x24   :  { %s404_s18 = scalar_lea.hbm %s550_s3, 2048 }
  0x25   :  { %p405_p2 = scmp.ne.s32.totalorder %s550_s3, %s404_s18  ;;  %p408_p3 = scmp.lt.u32.totalorder %s404_s18, %s550_s3 }
  0x27   :  { %p410_p4 = pnand %p408_p3, %p405_p2 }
  0x29   :  { %413 = shalt.err (!%p410_p4)
}
  0x2a   :  { %s414_s23 = scalar_lea.vmem %s42_s6, 2048  ;;  %p419_p6 = scmp.lt.s32.totalorder %s42_s6, %s42_s6 }
  0x2b   :  { %p415_p5 = scmp.ne.s32.totalorder %s42_s6, %s414_s23  ;;  %p420_p7 = scmp.lt.s32.totalorder %s414_s23, %s414_s23 }
  0x2d   :  { %p421_p8 = por %p420_p7, %p419_p6 }
  0x2f   :  { %p422_p9 = pnand %p421_p8, %p415_p5 }
  0x31   :  { %425 = shalt.err (!%p422_p9)
}
  0x32   :  { %47 = dma.hbm_to_vmem [thread:$0]  %s550_s3, 2048, %s42_s6, [#allocation6], %s455_s25, %s455_s25, %s456_s26  }
  0x33   :  { %448 = dma.done.wait [#allocation3], 128  }
  0x34   :  { %449 = vsyncadd [#allocation3], 4294967168 }
  0x35   :  { %450 = dma.done.wait [#allocation6], 2560  }
  0x36   :  { %451 = vsyncadd [#allocation6], 4294964736  ;;  %v459_v0 = vmov 0.0|0.0   ;;  %vm460_vm0 = vmmov 0   ;;  %v461_v1 = vmov 0.0   ;;  %v57_v2 = vld [vmem:[#allocation5] sm:$0xff] }
  0x37   :  { %319 = vmatprep.subr.bf16.mxu0 %v459_v0  ;;  %281 = vmatprep.mubr.msk.f32.mxu0 %vm460_vm0, %v461_v1  ;;  %v58_v3 = vld [vmem:[#allocation5 + $0x8] sm:$0xff]  ;;  %v59_v4 = vld [vmem:[#allocation5 + $0x10] sm:$0xff]  ;;  %v60_v6 = vld [vmem:[#allocation5 + $0x18] sm:$0xff]  ;;  %vm69_vm1 = vcmask 261120   ;;  %s462_s26 = smov [#allocation8]  }
  0x38   :  { %325 = vmatprep.subr.bf16.mxu1 %v459_v0  ;;  %316 = vmatprep.mubr.msk.f32.mxu1 %vm460_vm0, %v461_v1  ;;  %v320_v5 = vpack.c.bf16 %v58_v3, %v57_v2  ;;  %v146_v7 = vld [vmem:[#allocation7] sm:$0xff]  ;;  %v147_v8 = vld [vmem:[#allocation7 + $0x8] sm:$0xff]  ;;  %v148_v9 = vld [vmem:[#allocation7 + $0x10] sm:$0xff]  ;;  %v323_v11 = vpack.c.bf16 %v60_v6, %v59_v4  ;;  %s239_s27 = sshll.u32 %s462_s26, 4  ;;  %s240_s27 = int_to_ptr.vmem [resolvable:$true] %s239_s27 }
  0x39   :  { %v149_v10 = vld [vmem:[#allocation7 + $0x18] sm:$0xff]  ;;  %v326_v12 = vpack.c.bf16 %v147_v8, %v146_v7  ;;  %v150_v14 = vld [vmem:[#allocation7 + $0x20] sm:$0xff]  ;;  %v151_v15 = vld [vmem:[#allocation7 + $0x28] sm:$0xff]  ;;  %s426_s28 = scalar_lea.vmem %s240_s27, 128  ;;  %p431_p11 = scmp.lt.s32.totalorder %s240_s27, %s240_s27 }
  0x3a   :  { %321 = vmatpush3.bf16.msra.mxu0 %v320_v5  ;;  %v329_v13 = vpack.c.bf16 %v149_v10, %v148_v9  ;;  %v61_v16 = vld [vmem:[#allocation2] sm:$0xff]  ;;  %v332_v17 = vpack.c.bf16 %v151_v15, %v150_v14  ;;  %v152_v18 = vld [vmem:[#allocation7 + $0x30] sm:$0xff]  ;;  %v154_v21 = vld [vmem:[#allocation7 + $0x40] sm:$0xff]  ;;  %p427_p10 = scmp.ne.s32.totalorder %s240_s27, %s426_s28  ;;  %p432_p12 = scmp.lt.s32.totalorder %s426_s28, %s426_s28 }
  0x3b   :  { %322 = vmatprep.subr.bf16.mxu0 %v459_v0  ;;  %327 = vmatpush3.bf16.msra.mxu1 %v326_v12  ;;  %v153_v19 = vld [vmem:[#allocation7 + $0x38] sm:$0xff]  ;;  %v155_v22 = vld [vmem:[#allocation7 + $0x48] sm:$0xff]  ;;  %v156_v24 = vld [vmem:[#allocation7 + $0x50] sm:$0xff] }
  0x3c   :  { %328 = vmatprep.subr.bf16.mxu1 %v459_v0  ;;  %v335_v20 = vpack.c.bf16 %v153_v19, %v152_v18  ;;  %v338_v23 = vpack.c.bf16 %v155_v22, %v154_v21  ;;  %v157_v25 = vld [vmem:[#allocation7 + $0x58] sm:$0xff]  ;;  %v158_v27 = vld [vmem:[#allocation7 + $0x60] sm:$0xff]  ;;  %v159_v28 = vld [vmem:[#allocation7 + $0x68] sm:$0xff]  ;;  %p433_p13 = por %p432_p12, %p431_p11 }
  0x3d   :  { %v341_v26 = vpack.c.bf16 %v157_v25, %v156_v24  ;;  %v344_v29 = vpack.c.bf16 %v159_v28, %v158_v27  ;;  %v160_v30 = vld [vmem:[#allocation7 + $0x70] sm:$0xff]  ;;  %v161_v31 = vld [vmem:[#allocation7 + $0x78] sm:$0xff] }
  0x3e   :  { %324 = vmatpush3.bf16.msra.mxu0 %v323_v11  ;;  %v347_v32 = vpack.c.bf16 %v161_v31, %v160_v30  ;;  %v249_v33 = vld [vmem:[%s549_s2] ss:$0 sm:$0xff]  ;;  %p434_p0 = pnand %p433_p13, %p427_p10 }
  0x3f   :  { %330 = vmatpush3.bf16.msra.mxu1 %v329_v13 }
  0x40   :  { %331 = vmatprep.subr.bf16.mxu1 %v459_v0 }
  0x41   :  { %282 = vmatmul.mubr.msk.f32.vlgmr.msra.gmra.mrb[0].mxu0 %vm69_vm1, %v61_v16 }
  0x43   :  { %333 = vmatpush3.bf16.msra.mxu1 %v332_v17 }
  0x44   :  { %334 = vmatprep.subr.bf16.mxu1 %v459_v0 }
  0x47   :  { %336 = vmatpush3.bf16.msra.mxu1 %v335_v20 }
  0x48   :  { %337 = vmatprep.subr.bf16.mxu1 %v459_v0 }
  0x4b   :  { %339 = vmatpush3.bf16.msra.mxu1 %v338_v23 }
  0x4c   :  { %340 = vmatprep.subr.bf16.mxu1 %v459_v0 }
  0x4f   :  { %342 = vmatpush3.bf16.msra.mxu1 %v341_v26 }
  0x50   :  { %343 = vmatprep.subr.bf16.mxu1 %v459_v0 }
  0x53   :  { %345 = vmatpush3.bf16.msra.mxu1 %v344_v29 }
  0x54   :  { %346 = vmatprep.subr.bf16.mxu1 %v459_v0 }
  0x57   :  { %348 = vmatpush3.bf16.msra.mxu1 %v347_v32 }
 0x114   :  { %v139_v34 = vpop.f32.mrb[0].mxu0 }
 0x115   :  { %v140_v35 = vadd.f32 %v249_v33, %v139_v34  ;;  %v283_v36 = vpop.f32.mrb[1].mxu0 }
 0x117   :  { %358 = vtanh.f32 %v140_v35 }
 0x121   :  { %v359_v37 = vpop.eup %358 }
 0x122   :  { %v144_v38 = vmul.f32 %v359_v37, %v359_v37 }
 0x124   :  { %v145_v39 = vsub.f32 1.0, %v144_v38 }
 0x126   :  { %317 = vmatmul.mubr.f32.vlgmr.msra.gmra.mrb[0].mxu1 %v145_v39 }
 0x1f9   :  { %v228_v40 = vpop.f32.mrb[0].mxu1 }
 0x1fa   :  { %232 = vst.msk [vmem:[#allocation8] sm:$0xff] %vm69_vm1, %v228_v40  ;;  %v318_v41 = vpop.f32.mrb[1].mxu1 }
 0x1fb   :  { %437 = shalt.err (!%p434_p0)
}
 0x1fc   :  { %s438_s30 = scalar_lea.hbm %s551_s4, 128 }
 0x1fd   :  { %p439_p1 = scmp.ne.s32.totalorder %s551_s4, %s438_s30  ;;  %p442_p2 = scmp.lt.u32.totalorder %s438_s30, %s551_s4 }
 0x1ff   :  { %p444_p3 = pnand %p442_p2, %p439_p1 }
 0x201   :  { %447 = shalt.err (!%p444_p3)
}
 0x202   :  { %242 = dma.vmem_to_hbm [thread:$0]  %s240_s27, 128, %s551_s4, [#allocation4]  }
 0x203   :  { %452 = dma.done.wait [#allocation4], 128  }
 0x204   :  { %453 = vsyncadd [#allocation4], 4294967168 }
 0x205   :  { %246 = vsyncpa [#allocation3], 1 }
 0x206   :  { %247 = vsyncpa [#allocation6], 1 }
 0x207   :  { %248 = vsyncpa [#allocation4], 1 }

</bundles_post_ra>
